<compile_context>
chip_gen: v5e
topology: v5e:2x2
jax: 0.10.0
libtpu: 0.0.40
codegen_flags: <defaults>
</compile_context>

<pallas_src>
import jax
import jax.numpy as jnp
from jax.experimental import pallas as pl
from jax.experimental.pallas import tpu as pltpu


def _ensemble_kernel(x_ref, w_ref, b_ref, o_ref):
    # x_ref : (tb, tk)  compute_dtype -- batch x K slice of the shared input
    # w_ref : (tk, tn)  compute_dtype -- member m's weight tile (model dim squeezed)
    # b_ref : (1, tn)   f32           -- member m's bias tile
    # o_ref : (tb, tn)  f32           -- member m's output tile (resident over K)
    @pl.when(pl.program_id(3) == 0)
    def _():
        # Initialize the resident output block with the broadcast bias.
        # NOTE: `result * ones(x.shape)` from the reference is a no-op, omitted.
        o_ref[...] = jnp.broadcast_to(b_ref[...], o_ref.shape)

    # bf16 x bf16 -> f32 on the MXU; accumulate straight into the f32 output.
    o_ref[...] += jnp.dot(x_ref[...], w_ref[...],
                          preferred_element_type=jnp.float32)


def _divisor_tile(dim, cap):
    """Largest 128-multiple divisor of `dim` that is <= cap.

    Falls back to the full dim (always a legal block shape) when `dim` is not
    a multiple of 128 (small-shape case).
    """
    if dim % 128 != 0:
        return dim
    t = min(dim, max(128, cap - cap % 128))
    while t >= 128:
        if dim % t == 0:
            return t
        t -= 128
    return dim


def _working_set_bytes(tb, tn, tk, x_bytes, w_bytes):
    # Double-buffered input tiles + bias tile + f32 output tile.
    return (2 * tb * tk * x_bytes      # x tile
            + 2 * tk * tn * w_bytes    # weight tile (dominant HBM stream)
            + 2 * tn * 4               # bias tile
            + 2 * tb * tn * 4)         # output tile (f32, resident over K)


def expression_ensemble(x, weights, biases, *, compute_dtype=jnp.bfloat16,
                        tb=None, tn=None, tk=None,
                        vmem_budget_bytes=24 * 1024 * 1024):
    """x: (B, H), weights: (M, H, H), biases: (M, H) -> (M, B, H) f32.

    Computes stack_i(x @ W_i + b_i) with a native-layout grid over the member
    axis -- no weight relayout, no output transpose.  Pass x/weights already in
    `compute_dtype` (e.g. pre-cast to bf16 at model init) to keep all casts off
    the hot path.
    """
    M, H, H2 = weights.shape
    B, Hx = x.shape
    assert H2 == H and Hx == H, (weights.shape, x.shape)

    # No-ops if the caller already holds the data in compute_dtype.
    x = x.astype(compute_dtype)
    weights = weights.astype(compute_dtype)
    biases3 = biases.astype(jnp.float32).reshape(M, 1, H)   # tiny (M*H elems)

    # ---- tile selection under a per-generation-safe VMEM budget ------------
    x_bytes = w_bytes = jnp.dtype(compute_dtype).itemsize
    if tb is None:
        # Keep the whole batch resident when small; tile at the MXU height
        # (256) when B is large to bound the x/out VMEM footprint.
        tb = 256 if (B > 256 and B % 256 == 0) else B
    if tn is None:
        tn = _divisor_tile(H, 2048)
    if tk is None:
        tk = _divisor_tile(H, 2048)
    while (_working_set_bytes(tb, tn, tk, x_bytes, w_bytes) > vmem_budget_bytes
           and H % 128 == 0):
        if tk > 128:
            tk = _divisor_tile(H, tk // 2)
        elif tn > 128:
            tn = _divisor_tile(H, tn // 2)
        else:
            break

    grid = (M, B // tb, H // tn, H // tk)   # reduction axis (K) last

    out = pl.pallas_call(
        _ensemble_kernel,
        out_shape=jax.ShapeDtypeStruct((M, B, H), jnp.float32),
        grid=grid,
        in_specs=[
            # Shared input: identical for every member, K-sliced.
            pl.BlockSpec((tb, tk), lambda m, b, n, k: (b, k)),
            # Member m's weight tile, native (M, H, H) layout, model dim squeezed.
            pl.BlockSpec((None, tk, tn), lambda m, b, n, k: (m, k, n)),
            # Member m's bias tile.
            pl.BlockSpec((None, 1, tn), lambda m, b, n, k: (m, 0, n)),
        ],
        # Output written straight into the torch.stack layout (M, B, H).
        out_specs=pl.BlockSpec((None, tb, tn), lambda m, b, n, k: (m, b, n)),
        compiler_params=pltpu.CompilerParams(
            dimension_semantics=("parallel", "parallel", "parallel", "arbitrary"),
            vmem_limit_bytes=48 * 1024 * 1024,   # < v7x's 64 MiB physical VMEM
        ),
    )(x, weights, biases3)
    return out


def reference(x, weights, biases):
    # Plain-JAX reference of the ensemble forward (the *ones(x.shape) factor
    # is a semantic no-op and omitted).
    ys = [x @ weights[i] + biases[i][None, :] for i in range(weights.shape[0])]
    return jnp.stack(ys, axis=0).astype(jnp.float32)


if __name__ == "__main__":
    num_models = 3
    B, H = 8, 32

    key = jax.random.PRNGKey(0)
    kx, kw, kb = jax.random.split(key, 3)
    x = jax.random.normal(kx, (B, H), dtype=jnp.float32)
    weights = jax.random.normal(kw, (num_models, H, H), dtype=jnp.float32) * 0.1
    biases = jax.random.normal(kb, (num_models, H), dtype=jnp.float32) * 0.1

    # 1) Full-precision path: exact check against the f32 reference.
    out_f32 = jax.block_until_ready(
        expression_ensemble(x, weights, biases, compute_dtype=jnp.float32))
    ref_f32 = reference(x, weights, biases)
    assert out_f32.shape == (num_models, B, H), out_f32.shape
    assert jnp.allclose(out_f32, ref_f32, atol=1e-4, rtol=1e-4), "f32 mismatch"

    # 2) Default bf16-streaming path.  Pre-cast x/weights once ("model init")
    #    so the hot path performs no cast/relayout; compare against a reference
    #    built from the same bf16-quantized operands.
    x_bf16 = x.astype(jnp.bfloat16)
    w_bf16 = weights.astype(jnp.bfloat16)
    out_bf16 = jax.block_until_ready(
        expression_ensemble(x_bf16, w_bf16, biases))     # compute_dtype=bf16
    ref_bf16 = reference(x_bf16.astype(jnp.float32),
                         w_bf16.astype(jnp.float32), biases)
    assert out_bf16.shape == (num_models, B, H), out_bf16.shape
    assert jnp.allclose(out_bf16, ref_bf16, atol=2e-2, rtol=2e-2), "bf16 mismatch"

    print("KERNEL_OK")
</pallas_src>

<mosaic_0001>
module attributes {stable_mosaic.version = 11 : i64} {
  func.func @_ensemble_kernel(%arg0: i32, %arg1: i32, %arg2: i32, %arg3: i32, %arg4: memref<8x32xf32, #tpu.memory_space<vmem>>, %arg5: memref<1x32x32xf32, #tpu.memory_space<vmem>>, %arg6: memref<1x1x32xf32, #tpu.memory_space<vmem>>, %arg7: memref<1x8x32xf32, #tpu.memory_space<vmem>>) attributes {dimension_semantics = [#tpu.dimension_semantics<parallel>, #tpu.dimension_semantics<parallel>, #tpu.dimension_semantics<parallel>, #tpu.dimension_semantics<arbitrary>], iteration_bounds = array<i64: 3, 1, 1, 1>, scalar_prefetch = 0 : i64, scratch_operands = 0 : i64, tpu.core_type = #tpu.core_type<tc>, window_params = [{transform_indices = @transform_0, window_bounds = array<i64: 8, 32>}, {transform_indices = @transform_1, window_bounds = array<i64: 1, 32, 32>}, {transform_indices = @transform_2, window_bounds = array<i64: 1, 1, 32>}, {transform_indices = @transform_3, window_bounds = array<i64: 1, 8, 32>}]} {
    %c0_i32 = arith.constant 0 : i32
    %0 = arith.cmpi eq, %arg3, %c0_i32 : i32
    %1 = arith.extui %0 : i1 to i32
    %c0_i32_0 = arith.constant 0 : i32
    %2 = arith.cmpi ne, %1, %c0_i32_0 : i32
    scf.if %2 {
      %c0_11 = arith.constant 0 : index
      %c0_12 = arith.constant 0 : index
      %c0_13 = arith.constant 0 : index
      %13 = vector.load %arg6[%c0_11, %c0_12, %c0_13] : memref<1x1x32xf32, #tpu.memory_space<vmem>>, vector<1x1x32xf32>
      %14 = vector.shape_cast %13 : vector<1x1x32xf32> to vector<1x32xf32>
      %15 = vector.shape_cast %14 : vector<1x32xf32> to vector<1x32xf32>
      %16 = vector.broadcast %15 : vector<1x32xf32> to vector<8x32xf32>
      %c0_14 = arith.constant 0 : index
      %c0_15 = arith.constant 0 : index
      %c0_16 = arith.constant 0 : index
      %17 = vector.load %arg7[%c0_14, %c0_15, %c0_16] : memref<1x8x32xf32, #tpu.memory_space<vmem>>, vector<1x8x32xf32>
      %18 = vector.shape_cast %17 : vector<1x8x32xf32> to vector<8x32xf32>
      %19 = vector.shape_cast %16 : vector<8x32xf32> to vector<1x8x32xf32>
      tpu.vector_store %arg7[%c0_14, %c0_15, %c0_16], %19 {strides = array<i32>} : memref<1x8x32xf32, #tpu.memory_space<vmem>>, vector<1x8x32xf32>,
    } else {
    }
    %c0 = arith.constant 0 : index
    %c0_1 = arith.constant 0 : index
    %c0_2 = arith.constant 0 : index
    %3 = vector.load %arg7[%c0, %c0_1, %c0_2] : memref<1x8x32xf32, #tpu.memory_space<vmem>>, vector<1x8x32xf32>
    %4 = vector.shape_cast %3 : vector<1x8x32xf32> to vector<8x32xf32>
    %c0_3 = arith.constant 0 : index
    %c0_4 = arith.constant 0 : index
    %5 = vector.load %arg4[%c0_3, %c0_4] : memref<8x32xf32, #tpu.memory_space<vmem>>, vector<8x32xf32>
    %c0_5 = arith.constant 0 : index
    %c0_6 = arith.constant 0 : index
    %c0_7 = arith.constant 0 : index
    %6 = vector.load %arg5[%c0_5, %c0_6, %c0_7] : memref<1x32x32xf32, #tpu.memory_space<vmem>>, vector<1x32x32xf32>
    %7 = vector.shape_cast %6 : vector<1x32x32xf32> to vector<32x32xf32>
    %cst = arith.constant dense<0.000000e+00> : vector<8x32xf32>
    %8 = tpu.matmul %5, %7, %cst {dimension_numbers = #tpu.dot_dimension_numbers<[1], [0], [0], [1], [0, 0, 1, 1], [], []>} : vector<8x32xf32>, vector<32x32xf32>, vector<8x32xf32> -> vector<8x32xf32>
    %9 = arith.addf %4, %8 : vector<8x32xf32>
    %c0_8 = arith.constant 0 : index
    %c0_9 = arith.constant 0 : index
    %c0_10 = arith.constant 0 : index
    %10 = vector.load %arg7[%c0_8, %c0_9, %c0_10] : memref<1x8x32xf32, #tpu.memory_space<vmem>>, vector<1x8x32xf32>
    %11 = vector.shape_cast %10 : vector<1x8x32xf32> to vector<8x32xf32>
    %12 = vector.shape_cast %9 : vector<8x32xf32> to vector<1x8x32xf32>
    tpu.vector_store %arg7[%c0_8, %c0_9, %c0_10], %12 {strides = array<i32>} : memref<1x8x32xf32, #tpu.memory_space<vmem>>, vector<1x8x32xf32>,
    return
  }
  func.func @transform_0(%arg0: i32, %arg1: i32, %arg2: i32, %arg3: i32) -> (i32, i32) {
    %c0_i32 = arith.constant 0 : i32
    return %arg1, %arg3 : i32, i32
  }
  func.func @transform_1(%arg0: i32, %arg1: i32, %arg2: i32, %arg3: i32) -> (i32, i32, i32) {
    %c0_i32 = arith.constant 0 : i32
    return %arg0, %arg3, %arg2 : i32, i32, i32
  }
  func.func @transform_2(%arg0: i32, %arg1: i32, %arg2: i32, %arg3: i32) -> (i32, i32, i32) {
    %c0_i32 = arith.constant 0 : i32
    %c0_i32_0 = arith.constant 0 : i32
    return %arg0, %c0_i32, %arg2 : i32, i32, i32
  }
  func.func @transform_3(%arg0: i32, %arg1: i32, %arg2: i32, %arg3: i32) -> (i32, i32, i32) {
    %c0_i32 = arith.constant 0 : i32
    return %arg0, %arg1, %arg2 : i32, i32, i32
  }
}

</mosaic_0001>

<bundles_post_ra>
// kernel: tpu_custom_call.1
= control target key start
LH: loop header
LB: loop body
LE: loop exit
PB: predicated region body
PF: predicated region fallthrough
CT: control target
= control target key end

     0   :  { %8 = vsyncpa [#allocation3], 0  ;;  %s946_s0 = inlined_call_operand.hbm [shape: f32[8,32], index: 0, kind: input, shape index: {}]   ;;  %s947_s1 = inlined_call_operand.hbm [shape: f32[3,32,32], index: 1, kind: input, shape index: {}]   ;;  %s948_s2 = inlined_call_operand.hbm [shape: f32[3,1,32], index: 2, kind: input, shape index: {}]   ;;  %s949_s3 = inlined_call_operand.hbm [shape: f32[3,8,32], index: 3, kind: output, shape index: {}]  }
   0x1   :  { %9 = vsyncpa [#allocation6], 0 }
   0x2   :  { %11 = vsyncpa [#allocation6 + $0x1], 0 }
   0x3   :  { %12 = vsyncpa [#allocation4], 0 }
   0x4   :  { %14 = vsyncpa [#allocation4 + $0x1], 0  ;;  %s771_s12 = smov 0   ;;  %s773_s13 = smov 0  }
   0x5   :  { %s775_s14 = smov 0   ;;  %s777_s15 = smov 0  }
   0x6   :  { %s779_s16 = smov 0   ;;  %s781_s17 = smov 0  }
   0x7 LB: > { %s46_s18 = sadd.s32 1, %s742_s16  ;;  %s85_s19 = sadd.s32 1, %s734_s14  ;;  %s746_s17 = sphi %s781_s17, %s20_s17   ;;  %s742_s16 = sphi %s779_s16, %s960_s16   ;;  %s738_s15 = sphi %s777_s15, %s959_s15   ;;  %s734_s14 = sphi %s775_s14, %s958_s14   ;;  %s730_s13 = sphi %s773_s13, %s957_s13   ;;  %s726_s12 = sphi %s771_s12, %s956_s12  }
   0x8   : > { %p48_p0 = scmp.ge.s32.totalorder %s46_s18, 3  ;;  %p92_p1 = scmp.ne.s32.totalorder %s734_s14, %s730_s13 }
   0x9   : > { %p93_p2 = scmp.eq.s32.totalorder %s746_s17, 0  ;;  %p515_p4 = scmp.lt.s32.totalorder %s746_s17, 3 }
   0xa   : > { %s962_s18 = smov (%p48_p0, %s46_s18), 0  ;;  %s195_s22 = sand.u32 1, %s746_s17  }
   0xb   : > { %p811_p3 = por %p93_p2, %p92_p1  ;;  %s78_s21 = ssub.s32 %s742_s16, %s962_s18 }
   0xc   : > { %p83_p5 = scmp.eq.s32.totalorder %s78_s21, 0  ;;  %s197_s23 = sand.u32 1, %s734_s14  }
   0xd   : > { %s488_s24 = sshll.u32 %s742_s16, 5  ;;  %s476_s26 = sshll.u32 %s197_s23, 5 }
   0xe   : > { %s822_s25 = scalar_select %p83_p5, %s734_s14, %s85_s19  }
   0xf   : > { %s207_s29 = scalar_lea.hbm %s947_s1, %s488_s24  ;;  %s199_s4 = scalar_lea.vmem [#allocation5], %s476_s26 }
  0x10   : > { %s208_s30 = sshll.u32 %s207_s29, 4  ;;  %s210_s5 = sshll.u32 %s199_s4, 4  ;;  %s209_s30 = int_to_ptr.hbm [resolvable:$true] %s208_s30  ;;  %s211_s5 = int_to_ptr.vmem [resolvable:$true] %s210_s5 }
  0x11   : > { %p833_p6 = pnand %p515_p4, %p811_p3  ;;  %s837_s7 = scalar_lea.sflag [#allocation6], %s195_s22 }
  0x12   : > { %s748_s8 = smov 128   ;;  %s749_s9 = smov 8  }
  0x13   : > { %506 = dma.hbm_to_vmem [thread:$0]  (!%p833_p6), %s209_s30, 512, %s211_s5, %s837_s7, %s748_s8, %s748_s8, %s749_s9  }
  0x14   : > { %s843_s10 = sadd.s32 4294967295, %s746_s17   ;;  %s472_s11 = sadd.s32 4294967294, %s746_s17  }
  0x15   : > { %p98_p7 = scmp.ne.s32.totalorder %s730_s13, %s726_s12  ;;  %p99_p8 = scmp.eq.s32.totalorder %s843_s10, 0 }
  0x16   : > { %p154_p9 = scmp.eq.s32.totalorder %s843_s10, 2  ;;  %p160_p10 = scmp.eq.s32.totalorder %s472_s11, 2 }
  0x17   : > { %p473_p11 = scmp.ge.s32.totalorder %s746_s17, 1  ;;  %p853_p12 = por %p99_p8, %p98_p7 }
  0x18   : > { %p860_p13 = por %p154_p9, %p92_p1  ;;  %p864_p0 = por %p160_p10, %p98_p7 }
  0x19   : > { %p167_p2 = scmp.lt.s32.totalorder %s746_s17, 4  ;;  %s182_s26 = sshll.u32 %s946_s0, 4  ;;  %s183_s26 = int_to_ptr.hbm [resolvable:$true] %s182_s26 }
  0x1a   : > { %s750_s28 = smov [#allocation2]   ;;  %s227_s5 = scalar_lea.hbm %s948_s2, %s742_s16 }
  0x1b   : > { %p872_p3 = pnand %p473_p11, %p167_p2  ;;  %s184_s29 = sshll.u32 %s750_s28, 4  ;;  %s185_s29 = int_to_ptr.vmem [resolvable:$true] %s184_s29 }
  0x1c   : > { %s229_s8 = sshll.u32 %s227_s5, 4  ;;  %s223_s9 = scalar_lea.vmem [#allocation7], %s197_s23  ;;  %s230_s8 = int_to_ptr.hbm [resolvable:$true] %s229_s8 }
  0x1d   : > { %p499_p1 = pneg %p872_p3  ;;  %s231_s11 = sshll.u32 %s223_s9, 4  ;;  %s232_s11 = int_to_ptr.vmem [resolvable:$true] %s231_s11 }
  0x1e   : > { %509 = dma.hbm_to_vmem [thread:$0]  (!%p833_p6), %s230_s8, 16, %s232_s11, %s837_s7  }
  0x1f   : > { %p500_p4 = pnand %p499_p1, %p99_p8  ;;  %240 = sbr.rel (%p872_p3) target bundleno = 180 (0xb4), region = 32 }
  0x21   : > { %502 = dma.hbm_to_vmem [thread:$0]  (!%p500_p4), %s183_s26, 128, %s185_s29, [#allocation3]  }
  0x24   : > { %713 = dma.done.wait (%p99_p8), [#allocation3], 128  }
  0x25   : > { %715 = vsyncadd (%p99_p8), [#allocation3], 4294967168  ;;  %s247_s22 = sand.u32 1, %s843_s10   ;;  %s897_s24 = sand.u32 1, %s730_s13  }
  0x26   : > { %s481_s23 = sshll.u32 %s897_s24, 5  ;;  %s248_s26 = scalar_lea.sflag [#allocation6], %s247_s22 }
  0x27   : > { %s251_s6 = scalar_lea.vmem [#allocation5], %s481_s23 }
  0x28   : > { %717 = dma.done.wait (%p853_p12), %s248_s26, 528  }
  0x29   : > { %719 = vsyncadd (%p853_p12), %s248_s26, 4294966768  ;;  %s482_s7 = sshll.u32 %s897_s24, 3  ;;  %v304_v0 = vld [vmem:[%s251_s6 + $0x18] sm:$0xff]  ;;  %v303_v1 = vld [vmem:[%s251_s6 + $0x10] sm:$0xff]  ;;  %s260_s27 = scalar_lea.vmem [#allocation7], %s897_s24  ;;  %vm297_vm0 = vcmask 261120  }
  0x2a   : > { %321 = vmatpush.msra.mxu0 %v304_v0  ;;  %v302_v2 = vld [vmem:[%s251_s6 + $0x8] sm:$0xff]  ;;  %v569_v3 = vld [vmem:[%s260_s27] ss:$0 sm:$0xff]  ;;  %v301_v4 = vld [vmem:[%s251_s6] sm:$0xff]  ;;  %s287_s10 = scalar_lea.vmem [#allocation8], %s482_s7  ;;  %s485_s19 = sshll.u32 %s738_s15, 3 }
  0x2b   : > { %298 = vst.msk [vmem:[%s287_s10] sm:$0xff] %vm297_vm0, %v569_v3  ;;  %v300_v5 = vld [vmem:[#allocation2] sm:$0xff]  ;;  %s344_s30 = scalar_lea.hbm %s949_s3, %s485_s19  ;;  %s346_s4 = sshll.u32 %s287_s10, 4  ;;  %s347_s4 = int_to_ptr.vmem [resolvable:$true] %s346_s4 }
  0x2c   : > { %322 = vmatpush.msra.mxu0 %v303_v1  ;;  %s348_s5 = sshll.u32 %s344_s30, 4  ;;  %s332_s8 = scalar_lea.sflag [#allocation4], %s897_s24  ;;  %s349_s5 = int_to_ptr.hbm [resolvable:$true] %s348_s5 }
  0x2d   : > { %s674_s9 = sshra.s32 %s349_s5, 4  ;;  %s680_s23 = scalar_lea.hbm %s949_s3, 24  ;;  %s675_s9 = int_to_ptr.hbm [resolvable:$true] %s674_s9 }
  0x2e   : > { %323 = vmatpush.msra.mxu0 %v302_v2  ;;  %s676_s11 = scalar_lea.hbm %s675_s9, 8  ;;  %p681_p8 = scmp.lt.s32.totalorder %s675_s9, %s949_s3 }
  0x2f   : > { %p677_p5 = scmp.ne.s32.totalorder %s675_s9, %s676_s11  ;;  %p682_p9 = scmp.lt.s32.totalorder %s680_s23, %s676_s11 }
  0x30   : > { %324 = vmatpush.msra.mxu0 %v301_v4 }
  0x31   : > { %483 = vmatmul.msk.f32.vlgmr.msra.gmra.mxu0 %vm297_vm0, %v300_v5  ;;  %p678_p6 = pnand %p677_p5, %p860_p13  ;;  %p683_p10 = por %p682_p9, %p681_p8 }
  0x32   : > { %v299_v6 = vld [vmem:[%s287_s10] sm:$0xff] }
  0x33   : > { %p679_p7 = pneg %p678_p6 }
  0x35   : > { %p684_p11 = pnand %p683_p10, %p679_p7 }
  0xae   : > { %v326_v7 = vpop.f32.mrf.mxu0 }
  0xaf   : > { %v329_v8 = vadd.f32 %v326_v7, %v299_v6 }
  0xb1   : > { %330 = vst.msk [vmem:[%s287_s10] sm:$0xff] %vm297_vm0, %v329_v8 }
  0xb2   : > { %687 = shalt.err (!%p684_p11)
}
  0xb3   : > { %497 = dma.vmem_to_hbm [thread:$0]  (%p860_p13), %s347_s4, 128, %s349_s5, %s332_s8  }
  0xb4 PF: > { %p517_p12 = scmp.ge.s32.totalorder %s746_s17, 2  ;;  %s360_s24 = sand.u32 1, %s726_s12  }
  0xb5   : > { %s361_s7 = scalar_lea.sflag [#allocation4], %s360_s24 }
  0xb6   : > { %p511_p2 = pnand %p517_p12, %p864_p0 }
  0xb8   : > { %p512_p3 = pneg %p511_p2 }
  0xba   : > { %721 = dma.done.wait (%p512_p3), %s361_s7, 128  }
  0xbb   : > { %723 = vsyncadd (%p512_p3), %s361_s7, 4294967168  ;;  %s20_s17 = sadd.s32 1, %s746_s17   ;;  %s956_s12 = smov %s730_s13 }
  0xbc   : > { %p17_p1 = scmp.ge.s32.totalorder %s20_s17, 5   ;;  %s957_s13 = smov %s734_s14 }
  0xbd   : > { %s958_s14 = smov %s822_s25  ;;  %s959_s15 = smov %s742_s16 }
  0xbe   : > { %s960_s16 = smov %s962_s18  ;;  %19 = sbr.rel (!%p17_p1) target bundleno = 7 (0x7), region = 98 }
  0xc3   :  { %367 = vsyncpa [#allocation3], 1 }
  0xc4   :  { %369 = vsyncpa [#allocation3 + $0x1], 1 }
  0xc5   :  { %370 = vsyncpa [#allocation6], 1 }
  0xc6   :  { %372 = vsyncpa [#allocation6 + $0x1], 1 }
  0xc7   :  { %373 = vsyncpa [#allocation4], 1 }
  0xc8   :  { %375 = vsyncpa [#allocation4 + $0x1], 1 }

</bundles_post_ra>
